<compile_context>
chip_gen: v5e
topology: v5e:2x2
jax: 0.10.0
libtpu: 0.0.40
codegen_flags: <defaults>
</compile_context>

<pallas_src>
import math
from functools import partial

import numpy as np
import jax
import jax.numpy as jnp
from jax.experimental import pallas as pl
from jax.experimental.pallas import tpu as pltpu

EPS = 1e-5  # torch.nn.LayerNorm default eps


# ----------------------------------------------------------------------------- helpers

def _layer_norm(x2d, gamma, beta):
    mu = jnp.mean(x2d, axis=-1, keepdims=True)
    var = jnp.mean(jnp.square(x2d - mu), axis=-1, keepdims=True)
    return (x2d - mu) * jax.lax.rsqrt(var + EPS) * gamma + beta


# ----------------------------------------------------------------------------- prologue
# value = src @ Wv + bv   (hoisted out of the query-tiled main kernel; once per batch elem)

def _value_proj_kernel(src_ref, wv_ref, bv_ref, out_ref):
    v = jnp.dot(src_ref[...].astype(jnp.bfloat16), wv_ref[...],
                preferred_element_type=jnp.float32) + bv_ref[...]
    out_ref[...] = v.astype(jnp.bfloat16)


# ----------------------------------------------------------------------------- fused layer
# per grid step (n, t): one batch element, one tile of TQ queries.
#   x1 = norm2(tgt + MHSA(tgt+pos, tgt+pos, tgt))
#   x2 = norm1(x1 + MSDeformAttn(x1+pos, ref_points, value))
#   out = norm3(x2 + linear2(relu(linear1(x2))))

def _fused_layer_kernel(tgt_t_ref, pos_t_ref, tgt_f_ref, pos_f_ref, rp_ref, val_ref,
                        sa_wi_ref, sa_bi_ref, sa_wo_ref, sa_bo_ref, n2g_ref, n2b_ref,
                        ca_woff_ref, ca_boff_ref, ca_waw_ref, ca_baw_ref,
                        ca_wo_ref, ca_bo_ref, n1g_ref, n1b_ref,
                        f_w1_ref, f_b1_ref, f_w2_ref, f_b2_ref, n3g_ref, n3b_ref,
                        out_ref, ctx_ref, *,
                        spatial_shapes, n_heads, h_heads, n_points):
    TQ, D = tgt_t_ref.shape
    L = tgt_f_ref.shape[0]
    bf16 = jnp.bfloat16

    H = n_heads
    Dh = D // H
    scale = 1.0 / math.sqrt(Dh)

    x_t = tgt_t_ref[...]          # (TQ, D) query tile
    pos_t = pos_t_ref[...]
    x_f = tgt_f_ref[...]          # (L, D)  full sequence (self-attn keys/values)
    pos_f = pos_f_ref[...]

    # ======================= self-attention (heads batched) + residual + norm2 ==========
    wi = sa_wi_ref[...]           # (D, 3D) bf16  (in_proj_weight.T)
    bi = sa_bi_ref[...]           # (1, 3D) f32
    qk_t = (x_t + pos_t).astype(bf16)
    qk_f = (x_f + pos_f).astype(bf16)
    q = jnp.dot(qk_t, wi[:, 0:D], preferred_element_type=jnp.float32) + bi[:, 0:D]
    k = jnp.dot(qk_f, wi[:, D:2 * D], preferred_element_type=jnp.float32) + bi[:, D:2 * D]
    v = jnp.dot(x_f.astype(bf16), wi[:, 2 * D:3 * D],
                preferred_element_type=jnp.float32) + bi[:, 2 * D:3 * D]

    # head-major 3-D tensors -> two batched einsums instead of 2*H tiny matmuls
    qh = jnp.stack([q[:, h * Dh:(h + 1) * Dh] for h in range(H)], axis=0) * scale  # (H,TQ,Dh)
    kh = jnp.stack([k[:, h * Dh:(h + 1) * Dh] for h in range(H)], axis=0)          # (H,L,Dh)
    vh = jnp.stack([v[:, h * Dh:(h + 1) * Dh] for h in range(H)], axis=0)          # (H,L,Dh)

    logits = jnp.einsum('hqe,hke->hqk', qh.astype(bf16), kh.astype(bf16),
                        preferred_element_type=jnp.float32)                        # (H,TQ,L)
    m = jnp.max(logits, axis=-1, keepdims=True)
    e = jnp.exp(logits - m)
    attn = e * pl.reciprocal(jnp.sum(e, axis=-1, keepdims=True), approx=True)
    ctx_h = jnp.einsum('hqk,hke->hqe', attn.astype(bf16), vh.astype(bf16),
                       preferred_element_type=jnp.float32)                         # (H,TQ,Dh)
    for h in range(H):                       # merge heads into the VMEM scratch accumulator
        ctx_ref[:, h * Dh:(h + 1) * Dh] = ctx_h[h]

    proj = jnp.dot(ctx_ref[...].astype(bf16), sa_wo_ref[...],
                   preferred_element_type=jnp.float32) + sa_bo_ref[...]
    x1 = _layer_norm(x_t + proj, n2g_ref[...], n2b_ref[...])     # dropout2 == identity

    # ======================= temporal MS-deformable attention + residual + norm1 ========
    Fr = len(spatial_shapes)
    P = n_points
    Hd = h_heads
    Dh2 = D // Hd
    HP = Hd * P

    query = (x1 + pos_t).astype(bf16)
    # offsets: columns laid out (frame, {x,y}, head, point)   -> per-frame slices contiguous
    off = jnp.dot(query, ca_woff_ref[...],
                  preferred_element_type=jnp.float32) + ca_boff_ref[...]   # (TQ, Fr*2*Hd*P)
    # raw attention weights: columns laid out (head, frame, point) (torch layout)
    aw = jnp.dot(query, ca_waw_ref[...],
                 preferred_element_type=jnp.float32) + ca_baw_ref[...]     # (TQ, Hd*Fr*P)
    rp = rp_ref[...]                                                       # (TQ, 2*Fr)
    value_all = val_ref[...]                                               # (Lin, D) bf16

    # per-frame sampling pixel coordinates for ALL heads & points at once, plus the
    # per-frame coordinate grids (hoisted out of the head loop — frame-only dependence).
    frame_px, frame_py, frame_jj, frame_ii = [], [], [], []
    for f, (Hf, Wf) in enumerate(spatial_shapes):
        HW = Hf * Wf
        base = f * 2 * HP
        off_x = off[:, base:base + HP]            # (TQ, Hd*P), column = h*P + p
        off_y = off[:, base + HP:base + 2 * HP]
        ref_x = rp[:, 2 * f:2 * f + 1]            # (TQ, 1)
        ref_y = rp[:, 2 * f + 1:2 * f + 2]
        # F.grid_sample(align_corners=False):  px = (ref + off/W)*W - 0.5 == ref*W + off - 0.5
        frame_px.append(ref_x * float(Wf) + off_x - 0.5)
        frame_py.append(ref_y * float(Hf) + off_y - 0.5)
        hw = jax.lax.broadcasted_iota(jnp.int32, (1, 1, HW), 2)
        frame_jj.append((hw % Wf).astype(jnp.float32))    # column index
        frame_ii.append((hw // Wf).astype(jnp.float32))   # row index

    for h in range(Hd):
        # softmax over frames*points for this head (attention weights)
        a_h = aw[:, h * Fr * P:(h + 1) * Fr * P]          # (TQ, Fr*P)
        m = jnp.max(a_h, axis=-1, keepdims=True)
        e = jnp.exp(a_h - m)
        a_h = e * pl.reciprocal(jnp.sum(e, axis=-1, keepdims=True), approx=True)

        # dense bilinear weights, all P points vectorized; one block per frame,
        # concatenated over the full flattened temporal memory.
        S_parts = []
        for f, (Hf, Wf) in enumerate(spatial_shapes):
            px = frame_px[f][:, h * P:(h + 1) * P]        # (TQ, P)
            py = frame_py[f][:, h * P:(h + 1) * P]
            a_hf = a_h[:, f * P:(f + 1) * P]              # (TQ, P)
            wx = jnp.maximum(0.0, 1.0 - jnp.abs(px[:, :, None] - frame_jj[f]))  # (TQ,P,HW)
            wy = jnp.maximum(0.0, 1.0 - jnp.abs(py[:, :, None] - frame_ii[f]))
            S_parts.append(jnp.sum(a_hf[:, :, None] * wx * wy, axis=1))         # (TQ,HW)
        S = jnp.concatenate(S_parts, axis=-1)             # (TQ, Lin)

        v_h = value_all[:, h * Dh2:(h + 1) * Dh2]         # (Lin, Dh2) bf16
        ctx_ref[:, h * Dh2:(h + 1) * Dh2] = jnp.dot(S.astype(bf16), v_h,
                                                    preferred_element_type=jnp.float32)

    proj = jnp.dot(ctx_ref[...].astype(bf16), ca_wo_ref[...],
                   preferred_element_type=jnp.float32) + ca_bo_ref[...]
    x2 = _layer_norm(x1 + proj, n1g_ref[...], n1b_ref[...])      # dropout1 == identity

    # ======================= FFN + residual + norm3 =====================================
    hid = jnp.dot(x2.astype(bf16), f_w1_ref[...],
                  preferred_element_type=jnp.float32) + f_b1_ref[...]
    hid = jnp.maximum(hid, 0.0)                                   # relu; dropout3 == identity
    t2 = jnp.dot(hid.astype(bf16), f_w2_ref[...],
                 preferred_element_type=jnp.float32) + f_b2_ref[...]
    out_ref[...] = _layer_norm(x2 + t2, n3g_ref[...], n3b_ref[...])   # dropout4 == identity


# ----------------------------------------------------------------------------- params

def init_params(key, d_model, d_ffn, n_frames, h_heads, n_points):
    def dense(k, fan_in, fan_out, scale=0.05):
        kw, kb = jax.random.split(k)
        w = scale * jax.random.normal(kw, (fan_out, fan_in), jnp.float32)  # torch (out, in)
        b = scale * jax.random.normal(kb, (fan_out,), jnp.float32)
        return w, b

    bf16 = jnp.bfloat16
    keys = jax.random.split(key, 8)
    p = {}
    # --- nn.MultiheadAttention (self attention) ---
    w_in, b_in = dense(keys[0], d_model, 3 * d_model)
    w_out, b_out = dense(keys[1], d_model, d_model)
    p['sa_w_in_t'] = w_in.T.astype(bf16)
    p['sa_b_in'] = b_in[None, :]
    p['sa_w_out_t'] = w_out.T.astype(bf16)
    p['sa_b_out'] = b_out[None, :]
    p['norm2_g'] = jnp.ones((1, d_model), jnp.float32)
    p['norm2_b'] = jnp.zeros((1, d_model), jnp.float32)

    # --- MSDeformAttn (temporal cross attention) ---
    HFP2 = h_heads * n_frames * n_points * 2
    HFP = h_heads * n_frames * n_points
    w_off, b_off = dense(keys[2], d_model, HFP2, scale=0.3)
    # torch row layout (H, F, P, 2) -> kernel layout (F, 2, H, P) so the per-frame x / y
    # blocks are contiguous and the point/head math vectorizes without reshapes.
    w_off_p = (w_off.reshape(h_heads, n_frames, n_points, 2, d_model)
                    .transpose(1, 3, 0, 2, 4).reshape(HFP2, d_model))
    b_off_p = (b_off.reshape(h_heads, n_frames, n_points, 2)
                    .transpose(1, 3, 0, 2).reshape(HFP2))
    w_aw, b_aw = dense(keys[3], d_model, HFP)          # torch layout (H, F, P) kept
    w_val, b_val = dense(keys[4], d_model, d_model)
    w_op, b_op = dense(keys[5], d_model, d_model)
    p['ca_w_off_t'] = w_off_p.T.astype(bf16)
    p['ca_b_off'] = b_off_p[None, :]
    p['ca_w_aw_t'] = w_aw.T.astype(bf16)
    p['ca_b_aw'] = b_aw[None, :]
    p['ca_w_val_t'] = w_val.T.astype(bf16)
    p['ca_b_val'] = b_val[None, :]
    p['ca_w_out_t'] = w_op.T.astype(bf16)
    p['ca_b_out'] = b_op[None, :]
    p['norm1_g'] = jnp.ones((1, d_model), jnp.float32)
    p['norm1_b'] = jnp.zeros((1, d_model), jnp.float32)

    # --- FFN ---
    w1, b1 = dense(keys[6], d_model, d_ffn)
    w2, b2 = dense(keys[7], d_ffn, d_model)
    p['ffn_w1_t'] = w1.T.astype(bf16)
    p['ffn_b1'] = b1[None, :]
    p['ffn_w2_t'] = w2.T.astype(bf16)
    p['ffn_b2'] = b2[None, :]
    p['norm3_g'] = jnp.ones((1, d_model), jnp.float32)
    p['norm3_b'] = jnp.zeros((1, d_model), jnp.float32)
    return p


# ----------------------------------------------------------------------------- forward

def temporal_deformable_encoder_layer(params, tgt, query_pos, reference_points,
                                      src, src_spatial_shapes, frame_start_index,
                                      src_padding_mask=None,
                                      n_heads_self=8, h_heads=8, n_points=4):
    # TODO(synk): src_padding_mask masking of `value` not wired up (module default is None).
    assert src_padding_mask is None
    N, L, D = tgt.shape
    Lin = src.shape[1]
    Dffn = params['ffn_w1_t'].shape[1]

    # static spatial layout (specializes the kernel, like the Deformable-DETR CUDA op)
    shapes = tuple((int(h), int(w)) for h, w in np.asarray(src_spatial_shapes))
    starts = tuple(int(s) for s in np.asarray(frame_start_index))
    Fr = len(shapes)
    HFP2 = h_heads * Fr * 2 * n_points
    HFP = h_heads * Fr * n_points
    # frames must be stored contiguously in `src` in the listed order (standard flattening)
    expect = 0
    for f, (hf, wf) in enumerate(shapes):
        assert starts[f] == expect, "frame_start_index must match contiguous flattening"
        expect += hf * wf
    assert expect == Lin

    # query tiling: biggest tile that keeps the (8,128) constraint and fits VMEM
    TQ = L if L <= 128 else 128
    if L % TQ != 0:
        TQ = L
    QT = L // TQ

    rp_flat = reference_points.reshape(N, L, 2 * Fr)   # [x0, y0, x1, y1, ...] per frame

    # --- prologue: value projection, once per batch element (hoisted out of query tiles) ---
    value = pl.pallas_call(
        _value_proj_kernel,
        grid=(N,),
        in_specs=[pl.BlockSpec((None, Lin, D), lambda n: (n, 0, 0)),
                  pl.BlockSpec((D, D), lambda n: (0, 0)),
                  pl.BlockSpec((1, D), lambda n: (0, 0))],
        out_specs=pl.BlockSpec((None, Lin, D), lambda n: (n, 0, 0)),
        out_shape=jax.ShapeDtypeStruct((N, Lin, D), jnp.bfloat16),
        compiler_params=pltpu.CompilerParams(dimension_semantics=("parallel",)),
    )(src, params['ca_w_val_t'], params['ca_b_val'])

    # --- fused layer kernel over (batch, query-tile) ---
    kernel = partial(_fused_layer_kernel,
                     spatial_shapes=shapes, n_heads=n_heads_self,
                     h_heads=h_heads, n_points=n_points)

    tile_map = lambda n, t: (n, t, 0)   # per-query-tile blocks
    seq_map = lambda n, t: (n, 0, 0)    # full-sequence / full-memory blocks (per batch)
    w_map = lambda n, t: (0, 0)         # pinned weights

    Dh_self = D // n_heads_self
    flops = int(
        2 * N * L * D * (3 * D + D)                       # self-attn projections
        + 4 * N * n_heads_self * L * L * Dh_self          # logits + context
        + 2 * N * L * D * (HFP2 + HFP + D)                # deform linears
        + 2 * N * L * h_heads * Lin * (D // h_heads)      # sampling matmul
        + 6 * N * L * h_heads * n_points * Lin            # bilinear weight construction
        + 4 * N * L * D * Dffn                            # FFN
    )
    transcendentals = int(N * L * (n_heads_self * L + HFP) + 6 * N * L)
    bytes_accessed = int(sum(int(np.prod(a.shape)) * a.dtype.itemsize
                             for a in (tgt, query_pos, rp_flat, value))
                         + N * L * D * 4)
    cost = pl.CostEstimate(flops=flops, transcendentals=transcendentals,
                           bytes_accessed=bytes_accessed)

    out = pl.pallas_call(
        kernel,
        grid=(N, QT),
        in_specs=[
            # activations
            pl.BlockSpec((None, TQ, D), tile_map),         # tgt tile (queries)
            pl.BlockSpec((None, TQ, D), tile_map),         # query_pos tile
            pl.BlockSpec((None, L, D), seq_map),           # tgt full sequence (K/V)
            pl.BlockSpec((None, L, D), seq_map),           # query_pos full sequence
            pl.BlockSpec((None, TQ, 2 * Fr), tile_map),    # reference points tile
            pl.BlockSpec((None, Lin, D), seq_map),         # projected value (bf16)
            # self-attention params
            pl.BlockSpec((D, 3 * D), w_map), pl.BlockSpec((1, 3 * D), w_map),
            pl.BlockSpec((D, D), w_map), pl.BlockSpec((1, D), w_map),
            pl.BlockSpec((1, D), w_map), pl.BlockSpec((1, D), w_map),
            # deformable-attention params
            pl.BlockSpec((D, HFP2), w_map), pl.BlockSpec((1, HFP2), w_map),
            pl.BlockSpec((D, HFP), w_map), pl.BlockSpec((1, HFP), w_map),
            pl.BlockSpec((D, D), w_map), pl.BlockSpec((1, D), w_map),
            pl.BlockSpec((1, D), w_map), pl.BlockSpec((1, D), w_map),
            # FFN params
            pl.BlockSpec((D, Dffn), w_map), pl.BlockSpec((1, Dffn), w_map),
            pl.BlockSpec((Dffn, D), w_map), pl.BlockSpec((1, D), w_map),
            pl.BlockSpec((1, D), w_map), pl.BlockSpec((1, D), w_map),
        ],
        out_specs=pl.BlockSpec((None, TQ, D), tile_map),
        out_shape=jax.ShapeDtypeStruct((N, L, D), jnp.float32),
        scratch_shapes=[pltpu.VMEM((TQ, D), jnp.float32)],   # shared head-context accumulator
        compiler_params=pltpu.CompilerParams(
            dimension_semantics=("parallel", "parallel"),
            vmem_limit_bytes=32 * 1024 * 1024),
        cost_estimate=cost,
    )(tgt, query_pos, tgt, query_pos, rp_flat, value,
      params['sa_w_in_t'], params['sa_b_in'], params['sa_w_out_t'], params['sa_b_out'],
      params['norm2_g'], params['norm2_b'],
      params['ca_w_off_t'], params['ca_b_off'], params['ca_w_aw_t'], params['ca_b_aw'],
      params['ca_w_out_t'], params['ca_b_out'], params['norm1_g'], params['norm1_b'],
      params['ffn_w1_t'], params['ffn_b1'], params['ffn_w2_t'], params['ffn_b2'],
      params['norm3_g'], params['norm3_b'])
    return out


# ----------------------------------------------------------------------------- main

if __name__ == "__main__":
    d_model, d_ffn = 32, 64
    n_frames, h_heads, n_points = 4, 8, 4
    N, L = 2, 16                     # batch, number of queries
    Hs = Ws = 4                      # per-frame spatial size
    Lin = n_frames * Hs * Ws         # flattened temporal memory length

    key = jax.random.PRNGKey(0)
    kp, k1, k2, k3, k4 = jax.random.split(key, 5)
    params = init_params(kp, d_model, d_ffn, n_frames, h_heads, n_points)

    tgt = jax.random.normal(k1, (N, L, d_model), jnp.float32)
    query_pos = jax.random.normal(k2, (N, L, d_model), jnp.float32)
    reference_points = jax.random.uniform(k3, (N, L, n_frames, 2), jnp.float32)
    src = jax.random.normal(k4, (N, Lin, d_model), jnp.float32)
    src_spatial_shapes = np.array([[Hs, Ws]] * n_frames, np.int32)
    frame_start_index = np.array([f * Hs * Ws for f in range(n_frames)], np.int32)

    out = temporal_deformable_encoder_layer(params, tgt, query_pos, reference_points,
                                            src, src_spatial_shapes, frame_start_index)
    out = jax.block_until_ready(out)
    assert out.shape == (N, L, d_model)
    assert bool(jnp.all(jnp.isfinite(out)))
    print("KERNEL_OK")
</pallas_src>

<mosaic_0001>
module attributes {stable_mosaic.version = 11 : i64} {
  func.func @_value_proj_kernel(%arg0: i32, %arg1: memref<1x64x32xf32, #tpu.memory_space<vmem>>, %arg2: memref<32x32xbf16, #tpu.memory_space<vmem>>, %arg3: memref<1x32xf32, #tpu.memory_space<vmem>>, %arg4: memref<1x64x32xbf16, #tpu.memory_space<vmem>>) attributes {dimension_semantics = [#tpu.dimension_semantics<parallel>], iteration_bounds = array<i64: 2>, scalar_prefetch = 0 : i64, scratch_operands = 0 : i64, tpu.core_type = #tpu.core_type<tc>, window_params = [{transform_indices = @transform_0, window_bounds = array<i64: 1, 64, 32>}, {pipeline_mode = #tpu.pipeline_mode<synchronous>, transform_indices = @transform_1, window_bounds = array<i64: 32, 32>}, {pipeline_mode = #tpu.pipeline_mode<synchronous>, transform_indices = @transform_2, window_bounds = array<i64: 1, 32>}, {transform_indices = @transform_3, window_bounds = array<i64: 1, 64, 32>}]} {
    %c0 = arith.constant 0 : index
    %c0_0 = arith.constant 0 : index
    %c0_1 = arith.constant 0 : index
    %0 = vector.load %arg1[%c0, %c0_0, %c0_1] : memref<1x64x32xf32, #tpu.memory_space<vmem>>, vector<1x64x32xf32>
    %1 = vector.shape_cast %0 : vector<1x64x32xf32> to vector<64x32xf32>
    %2 = arith.truncf %1 : vector<64x32xf32> to vector<64x32xbf16>
    %c0_2 = arith.constant 0 : index
    %c0_3 = arith.constant 0 : index
    %3 = vector.load %arg2[%c0_2, %c0_3] : memref<32x32xbf16, #tpu.memory_space<vmem>>, vector<32x32xbf16>
    %cst = arith.constant dense<0.000000e+00> : vector<64x32xf32>
    %4 = tpu.matmul %2, %3, %cst {dimension_numbers = #tpu.dot_dimension_numbers<[1], [0], [0], [1], [0, 0, 1, 1], [], []>} : vector<64x32xbf16>, vector<32x32xbf16>, vector<64x32xf32> -> vector<64x32xf32>
    %c0_4 = arith.constant 0 : index
    %c0_5 = arith.constant 0 : index
    %5 = vector.load %arg3[%c0_4, %c0_5] : memref<1x32xf32, #tpu.memory_space<vmem>>, vector<1x32xf32>
    %6 = vector.broadcast %5 : vector<1x32xf32> to vector<64x32xf32>
    %7 = arith.addf %4, %6 : vector<64x32xf32>
    %8 = arith.truncf %7 : vector<64x32xf32> to vector<64x32xbf16>
    %c0_6 = arith.constant 0 : index
    %c0_7 = arith.constant 0 : index
    %c0_8 = arith.constant 0 : index
    %9 = vector.load %arg4[%c0_6, %c0_7, %c0_8] : memref<1x64x32xbf16, #tpu.memory_space<vmem>>, vector<1x64x32xbf16>
    %10 = vector.shape_cast %9 : vector<1x64x32xbf16> to vector<64x32xbf16>
    %11 = vector.shape_cast %8 : vector<64x32xbf16> to vector<1x64x32xbf16>
    tpu.vector_store %arg4[%c0_6, %c0_7, %c0_8], %11 {strides = array<i32>} : memref<1x64x32xbf16, #tpu.memory_space<vmem>>, vector<1x64x32xbf16>,
    return
  }
  func.func @transform_0(%arg0: i32) -> (i32, i32, i32) {
    %c0_i32 = arith.constant 0 : i32
    %c0_i32_0 = arith.constant 0 : i32
    %c0_i32_1 = arith.constant 0 : i32
    return %arg0, %c0_i32, %c0_i32_0 : i32, i32, i32
  }
  func.func @transform_1(%arg0: i32) -> (i32, i32) {
    %c0_i32 = arith.constant 0 : i32
    %c0_i32_0 = arith.constant 0 : i32
    %c0_i32_1 = arith.constant 0 : i32
    return %c0_i32, %c0_i32_0 : i32, i32
  }
  func.func @transform_2(%arg0: i32) -> (i32, i32) {
    %c0_i32 = arith.constant 0 : i32
    %c0_i32_0 = arith.constant 0 : i32
    %c0_i32_1 = arith.constant 0 : i32
    return %c0_i32, %c0_i32_0 : i32, i32
  }
  func.func @transform_3(%arg0: i32) -> (i32, i32, i32) {
    %c0_i32 = arith.constant 0 : i32
    %c0_i32_0 = arith.constant 0 : i32
    %c0_i32_1 = arith.constant 0 : i32
    return %arg0, %c0_i32, %c0_i32_0 : i32, i32, i32
  }
}

</mosaic_0001>

<bundles_post_ra>
// kernel: tpu_custom_call.1
= control target key start
LH: loop header
LB: loop body
LE: loop exit
PB: predicated region body
PF: predicated region fallthrough
CT: control target
= control target key end

     0   :  { %s388_s12 = smov 0   ;;  %s430_s0 = inlined_call_operand.vmem [shape: f32[2,64,32], index: 0, kind: input, shape index: {}]   ;;  %s431_s1 = inlined_call_operand.vmem [shape: bf16[32,32], index: 1, kind: input, shape index: {}]   ;;  %s432_s2 = inlined_call_operand.vmem [shape: f32[1,32], index: 2, kind: input, shape index: {}]   ;;  %s433_s3 = inlined_call_operand.vmem [shape: bf16[2,64,32], index: 3, kind: output, shape index: {}]  }
   0x1 LB: > { %s318_s13 = sadd.s32 4294967295, %s366_s12   ;;  %p322_p0 = scmp.ge.s32.totalorder %s366_s12, 1  ;;  %s366_s12 = sphi %s388_s12, %s13_s12  }
   0x2   : > { %p137_p1 = scmp.lt.s32.totalorder %s366_s12, 3 }
   0x4   : > { %p138_p2 = pnand %p322_p0, %p137_p1 }
   0x5   : > { %p161_p3 = scmp.lt.s32.totalorder (!%p138_p2), %s318_s13, 1 }
   0x6   : > { %141 = sbr.rel (%p138_p2) target bundleno = 166 (0xa6), region = 32 }
   0xb   : > { %v344_v0 = vld [vmem:[%s431_s1 + $0x8] sm:$0xff]  ;;  %v343_v1 = vld [vmem:[%s431_s1] sm:$0xff]  ;;  %s435_s13 = smov (!%p161_p3, %s318_s13), 1  ;;  %vm204_vm0 = vcmask 261120   ;;  %vm254_vm1 = vcmask 257024  }
   0xc   : > { %223 = vmatpush.bf16.msra.mxu0 %v344_v0  ;;  %345 = vmatpush.bf16.msra.mxu1 %v344_v0  ;;  %s341_s18 = sshll.u32 %s435_s13, 6  ;;  %v359_v14 = vld [vmem:[%s432_s2] ss:$0 sm:$0xff]  ;;  %s342_s24 = sshll.u32 %s435_s13, 5 }
   0xd   : > { %346 = vmatpush.bf16.msra.mxu2 %v344_v0  ;;  %347 = vmatpush.bf16.msra.mxu3 %v344_v0  ;;  %s165_s21 = scalar_lea.vmem %s430_s0, %s341_s18  ;;  %s170_s27 = scalar_lea.vmem %s433_s3, %s342_s24 }
   0xe   : > { %v172_v2 = vld [vmem:[%s165_s21] sm:$0xff]  ;;  %v173_v3 = vld [vmem:[%s165_s21 + $0x8] sm:$0xff]  ;;  %v174_v4 = vld [vmem:[%s165_s21 + $0x10] sm:$0xff] }
   0xf   : > { %v180_v5 = vpack.c.bf16 %v173_v3, %v172_v2  ;;  %v175_v6 = vld [vmem:[%s165_s21 + $0x18] sm:$0xff]  ;;  %v176_v7 = vld [vmem:[%s165_s21 + $0x20] sm:$0xff]  ;;  %v177_v8 = vld [vmem:[%s165_s21 + $0x28] sm:$0xff] }
  0x10   : > { %224 = vmatpush.bf16.msra.mxu0 %v343_v1  ;;  %348 = vmatpush.bf16.msra.mxu1 %v343_v1  ;;  %v181_v9 = vpack.c.bf16 %v175_v6, %v174_v4  ;;  %v182_v10 = vpack.c.bf16 %v177_v8, %v176_v7  ;;  %v178_v11 = vld [vmem:[%s165_s21 + $0x30] sm:$0xff]  ;;  %v179_v12 = vld [vmem:[%s165_s21 + $0x38] sm:$0xff] }
  0x11   : > { %349 = vmatpush.bf16.msra.mxu2 %v343_v1  ;;  %350 = vmatpush.bf16.msra.mxu3 %v343_v1  ;;  %v183_v13 = vpack.c.bf16 %v179_v12, %v178_v11 }
  0x13   : > { %335 = vmatmul.msk.bf16.vlgmr.msra.gmra.mxu0 %vm204_vm0, %v180_v5  ;;  %336 = vmatmul.msk.bf16.vlgmr.msra.gmra.mxu1 %vm204_vm0, %v181_v9 }
  0x14   : > { %337 = vmatmul.msk.bf16.vlgmr.msra.gmra.mxu2 %vm204_vm0, %v182_v10  ;;  %338 = vmatmul.msk.bf16.vlgmr.msra.gmra.mxu3 %vm204_vm0, %v183_v13 }
  0x90   : > { %v226_v15 = vpop.f32.mrf.mxu0  ;;  %v231_v17 = vpop.f32.mrf.mxu1 }
  0x91   : > { %v227_v16 = vadd.f32 %v359_v14, %v226_v15  ;;  %v232_v18 = vadd.f32 %v359_v14, %v231_v17 }
  0x93   : > { %v246_v19 = vpack.c.bf16 %v227_v16, %v227_v16  ;;  %v248_v20 = vpack.c.bf16 %v232_v18, %v232_v18 }
  0x95   : > { %255 = vst.msk [vmem:[%s170_s27] sm:$0xf] %vm254_vm1, %v246_v19 }
  0x96   : > { %257 = vst.msk [vmem:[%s170_s27 + $0x8] sm:$0xf] %vm254_vm1, %v248_v20 }
  0x97   : > { %v236_v21 = vpop.f32.mrf.mxu2  ;;  %v241_v23 = vpop.f32.mrf.mxu3 }
  0x98   : > { %v237_v22 = vadd.f32 %v359_v14, %v236_v21  ;;  %v228_v24 = vpop.f32.mrf.mxu0  ;;  %v242_v25 = vadd.f32 %v359_v14, %v241_v23  ;;  %v233_v27 = vpop.f32.mrf.mxu1 }
  0x99   : > { %v229_v26 = vadd.f32 %v359_v14, %v228_v24  ;;  %v234_v29 = vadd.f32 %v359_v14, %v233_v27 }
  0x9a   : > { %v250_v28 = vpack.c.bf16 %v237_v22, %v237_v22  ;;  %v252_v30 = vpack.c.bf16 %v242_v25, %v242_v25 }
  0x9b   : > { %v247_v31 = vpack.c.bf16 %v229_v26, %v229_v26  ;;  %v249_v32 = vpack.c.bf16 %v234_v29, %v234_v29 }
  0x9c   : > { %259 = vst.msk [vmem:[%s170_s27 + $0x10] sm:$0xf] %vm254_vm1, %v250_v28 }
  0x9d   : > { %261 = vst.msk [vmem:[%s170_s27 + $0x18] sm:$0xf] %vm254_vm1, %v252_v30 }
  0x9e   : > { %256 = vst.msk [vmem:[%s170_s27 + $0x4] sm:$0xf] %vm254_vm1, %v247_v31 }
  0x9f   : > { %258 = vst.msk [vmem:[%s170_s27 + $0xc] sm:$0xf] %vm254_vm1, %v249_v32  ;;  %v238_v33 = vpop.f32.mrf.mxu2  ;;  %v243_v35 = vpop.f32.mrf.mxu3 }
  0xa0   : > { %v239_v34 = vadd.f32 %v359_v14, %v238_v33  ;;  %v244_v36 = vadd.f32 %v359_v14, %v243_v35 }
  0xa2   : > { %v251_v37 = vpack.c.bf16 %v239_v34, %v239_v34  ;;  %v253_v38 = vpack.c.bf16 %v244_v36, %v244_v36 }
  0xa4   : > { %260 = vst.msk [vmem:[%s170_s27 + $0x14] sm:$0xf] %vm254_vm1, %v251_v37 }
  0xa5   : > { %262 = vst.msk [vmem:[%s170_s27 + $0x1c] sm:$0xf] %vm254_vm1, %v253_v38 }
  0xa6 PF: > { %s13_s12 = sadd.s32 1, %s366_s12  }
  0xa7   : > { %p10_p4 = scmp.ge.s32.totalorder %s13_s12, 4  }
  0xa9   :  { %12 = sbr.rel (!%p10_p4) target bundleno = 1 (0x1), region = 62 }

</bundles_post_ra>
